<compile_context>
chip_gen: v7x
topology: tpu7x:2x2x1
jax: 0.10.0
libtpu: 0.0.40
codegen_flags: <defaults>
</compile_context>

<pallas_src>
import functools
import math

import jax
import jax.numpy as jnp
import numpy as np
from jax import lax
from jax.experimental import pallas as pl
from jax.experimental.pallas import tpu as pltpu

VMEM = pl.BlockSpec(memory_space=pltpu.MemorySpace.VMEM)
SMEM = pl.BlockSpec(memory_space=pltpu.MemorySpace.SMEM)


# --------------------------------------------------------------------------
# Single fused forward kernel (grid=(), everything resident in VMEM).
# --------------------------------------------------------------------------
def _fused_forward_kernel(
    scal_ref,      # SMEM (2,)            : [Wo bias, phi] (learnable scalars)
    x_ref,         # VMEM (n, d)
    rand_ref,      # VMEM (n, 2d + n)     : uniform(0,1) [drop | feature | edge]
    w_in_ref,      # VMEM (d, 2d + g)     : [wq_folded | wk | wg]
    w_head_ref,    # VMEM (g, m + d)      : [wm | wi]
    b_ref,         # VMEM (1, 2d+g+m+d)   : [bq_f | bk | bg | bm | bi]
    *out_refs,     # z (n,g), x_imp (n,d), loss (1,1) SMEM, [adj (n,n) if debug]
    tau, alpha, beta, keep_drop, keep_feat, keep_edge, d, g, m, debug):
    f32 = jnp.float32
    n = x_ref.shape[0]
    z_out, ximp_out, loss_out = out_refs[0], out_refs[1], out_refs[2]

    wo_b = scal_ref[0]          # learnable Wo bias (runtime scalar)
    phi = scal_ref[1]           # learnable threshold phi

    # one shared (n, n) identity: adjacency-diag zeroing + GCN self loops
    ii = lax.broadcasted_iota(jnp.int32, (n, n), 0)
    jj = lax.broadcasted_iota(jnp.int32, (n, n), 1)
    eye = jnp.where(ii == jj, 1.0, 0.0).astype(f32)

    # ---- Bernoulli masks from one packed uniform array ---------------------
    rand = rand_ref[...]
    drop_mask = (rand[:, :d] < keep_drop).astype(f32)
    feat_mask = (rand[:, d:2 * d] < keep_feat).astype(f32)
    edge_mask = (rand[:, 2 * d:] < keep_edge).astype(f32)

    # ---- x = Dropout(x) (training semantics); DataAug feature mask ---------
    x = x_ref[...] * drop_mask * (1.0 / keep_drop)
    x_aug = feat_mask * x

    bias = b_ref[...]

    # ---- ONE fused projection for both views:  [x ; x_aug] @ [wq_f|wk|wg] --
    proj = jnp.dot(jnp.concatenate([x, x_aug], axis=0), w_in_ref[...],
                   preferred_element_type=f32)                   # (2n, 2d+g)
    q = proj[:n, :d] + bias[:, :d]
    k = proj[:n, d:2 * d] + bias[:, d:2 * d]
    xw = proj[:n, 2 * d:]        # GCNConv bias is applied AFTER aggregation
    xw_aug = proj[n:, 2 * d:]

    # ---- GraphConstructor ---------------------------------------------------
    # Wo weights and 1/sqrt(d_k) are folded into wq_f/bq_f at param-setup time,
    # so multi-head attention + Wo collapse into one (n, n) score matmul.
    scores = lax.dot_general(q, k, (((1,), (1,)), ((), ())),
                             preferred_element_type=f32) + wo_b
    sexp = jnp.exp(scores - jnp.max(scores, axis=1, keepdims=True))
    p_attn = sexp / jnp.sum(sexp, axis=1, keepdims=True)         # softmax(dim=1)
    adj = jnp.where(p_attn >= phi, 1.0, 0.0).astype(f32) * (1.0 - eye)
    adj_aug = edge_mask * adj                                    # DataAug edges

    # ---- dense GCNConv:  z[t] = dinv[t] * sum_s Ahat[s,t] * dinv[s] * xw[s] -
    # Degree scaling folded into the thin (n, g) operands; the column-sum
    # degrees are produced directly as an (n, 1) column via Ahat^T @ 1.
    ones_col = jnp.ones((n, 1), f32)
    bg = bias[:, 2 * d:2 * d + g]

    def gcn(a, feat_w):
        ahat = a + eye
        deg = lax.dot_general(ahat, ones_col, (((0,), (0,)), ((), ())),
                              preferred_element_type=f32)        # (n,1) in-deg
        dinv = lax.rsqrt(deg)
        agg = lax.dot_general(ahat, feat_w * dinv, (((0,), (0,)), ((), ())),
                              preferred_element_type=f32)        # (n, g)
        return agg * dinv + bg

    z = gcn(adj, xw)
    z_aug = gcn(adj_aug, xw_aug)

    # ---- heads: ONE matmul gives z_mlp, z_mlp_aug and x_imp -----------------
    heads = jnp.dot(jnp.concatenate([z, z_aug], axis=0), w_head_ref[...],
                    preferred_element_type=f32)                  # (2n, m+d)
    x_imp = heads[:n, m:] + bias[:, 2 * d + g + m:]
    zc = heads[:, :m] + bias[:, 2 * d + g:2 * d + g + m]         # [z_mlp; z_mlp_aug]

    # ---- merged contrastive loss: one Gram matrix, shared diagonals ---------
    inv_tau = 1.0 / tau
    zc = zc * lax.rsqrt(jnp.sum(zc * zc, axis=1, keepdims=True) + 1e-24)
    e_all = jnp.exp(lax.dot_general(zc, zc, (((1,), (1,)), ((), ())),
                                    preferred_element_type=f32) * inv_tau)
    # cross-view diagonal exp(zn_i . zan_i / tau), shared by both directions
    diag_inter = jnp.exp(jnp.sum(zc[:n] * zc[n:], axis=1, keepdims=True)
                         * inv_tau)                              # (n, 1)
    diag_cross = jnp.concatenate([diag_inter, diag_inter], axis=0)
    diag_intra = math.exp(inv_tau)   # rows are unit norm -> compile-time const

    # row i (< n) of e_all = [e_zz[i,:], e_za[i,:]]  (direction 1, mask adj)
    # row n+i       of e_all = [e_az[i,:], e_aa[i,:]] (direction 2, mask adj_aug)
    acat = jnp.concatenate([adj, adj_aug], axis=0)               # (2n, n)
    half = e_all[:, :n] + e_all[:, n:]                           # (2n, n)
    pos = diag_cross + jnp.sum(half * acat, axis=1, keepdims=True)
    den = jnp.sum(e_all, axis=1, keepdims=True) - diag_intra
    cnt = 2.0 * jnp.sum(acat, axis=1, keepdims=True) + 1.0
    per_row = jnp.log(pos / den) / cnt                           # (2n, 1)
    l1 = -jnp.sum(per_row[:n]) * (1.0 / n)
    l2 = -jnp.sum(per_row[n:]) * (1.0 / n)

    # ---- outputs -------------------------------------------------------------
    z_out[...] = z
    ximp_out[...] = x_imp
    loss_out[0, 0] = alpha * l1 + beta * l2
    if debug:                           # verification-only output, build-gated
        out_refs[3][...] = adj


# --------------------------------------------------------------------------
# Wrapper: single pallas_call for the whole forward pass.
# --------------------------------------------------------------------------
def build_forward(cfg, debug=False):
    d = int(cfg["input_dim"])
    g = int(cfg["gcn_dim"])
    m = int(cfg["mlp_dim"])
    kernel = functools.partial(
        _fused_forward_kernel,
        tau=float(cfg["tau"]), alpha=float(cfg["alpha"]), beta=float(cfg["beta"]),
        keep_drop=1.0 - float(cfg["dropout"]),
        keep_feat=1.0 - float(cfg["prob_feature"]),
        keep_edge=1.0 - float(cfg["prob_edge"]),
        d=d, g=g, m=m, debug=debug)

    def forward(x, rand, packed):
        n = x.shape[0]
        out_shape = [
            jax.ShapeDtypeStruct((n, g), jnp.float32),   # z
            jax.ShapeDtypeStruct((n, d), jnp.float32),   # x_imp
            jax.ShapeDtypeStruct((1, 1), jnp.float32),   # loss_cl (scalar)
        ]
        out_specs = [VMEM, VMEM, SMEM]
        if debug:
            out_shape.append(jax.ShapeDtypeStruct((n, n), jnp.float32))  # adj
            out_specs.append(VMEM)

        # rough cost hint so XLA can schedule around this tiny custom call
        flops = 2 * ((2 * n) * d * (2 * d + g)      # fused projection
                     + n * n * d                    # attention scores
                     + 2 * (n * n * (g + 1))        # two GCN aggregations
                     + (2 * n) * g * (m + d)        # heads
                     + (2 * n) * m * (2 * n))       # contrastive Gram matrix
        transcendentals = 5 * n * n + 7 * n
        bytes_accessed = 4 * (x.size + rand.size + packed["w_in"].size
                              + packed["w_head"].size + packed["b_all"].size
                              + 2 + n * g + n * d + 1 + (n * n if debug else 0))

        outs = pl.pallas_call(
            kernel,
            out_shape=tuple(out_shape),
            in_specs=[SMEM] + [VMEM] * 5,
            out_specs=tuple(out_specs),
            cost_estimate=pl.CostEstimate(
                flops=int(flops), transcendentals=int(transcendentals),
                bytes_accessed=int(bytes_accessed)),
        )(packed["scal"], x, rand, packed["w_in"], packed["w_head"],
          packed["b_all"])

        if debug:
            z, x_imp, loss, adj = outs
            return z, x_imp, loss[0, 0], adj
        z, x_imp, loss = outs
        return z, x_imp, loss[0, 0]

    return forward


# --------------------------------------------------------------------------
# Driver + verification.
# --------------------------------------------------------------------------
if __name__ == "__main__":
    cfg = dict(
        input_dim=32, graph_head=4, phi=0.1, gcn_dim=16, mlp_dim=16,
        prob_feature=0.2, prob_edge=0.2, tau=0.5, alpha=0.5, beta=0.5,
        dropout=0.1,
    )
    N, D, H = 8, cfg["input_dim"], cfg["graph_head"]
    G, M = cfg["gcn_dim"], cfg["mlp_dim"]
    d_k = D // H

    key = jax.random.PRNGKey(0)
    ks = jax.random.split(key, 10)

    def init_linear(k, fan_in, fan_out):
        k1, k2 = jax.random.split(k)
        lim = 1.0 / math.sqrt(fan_in)
        w = jax.random.uniform(k1, (fan_in, fan_out), jnp.float32, -lim, lim)
        b = jax.random.uniform(k2, (1, fan_out), jnp.float32, -lim, lim)
        return w, b

    wq, bq = init_linear(ks[0], D, D)
    wk, bk = init_linear(ks[1], D, D)
    wo_w = jax.random.uniform(ks[2], (H,), jnp.float32, -0.5, 0.5)
    wo_b = jax.random.uniform(ks[3], (), jnp.float32, -0.5, 0.5)
    wg, bg = init_linear(ks[4], D, G)
    wi, bi = init_linear(ks[5], G, D)
    wm, bm = init_linear(ks[6], G, M)

    # Parameter-only preprocessing (ONCE, outside the forward): fold Wo's
    # weights and the 1/sqrt(d_k) attention scale into the Q projection, then
    # pack all weights/biases into 3 arrays (+ the 2 learnable scalars).
    wo_expand = (jnp.repeat(wo_w, d_k) / math.sqrt(d_k)).reshape(1, D)
    wq_f, bq_f = wq * wo_expand, bq * wo_expand
    packed = dict(
        scal=jnp.stack([wo_b, jnp.asarray(cfg["phi"], jnp.float32)]),
        w_in=jnp.concatenate([wq_f, wk, wg], axis=1),            # (D, 2D+G)
        w_head=jnp.concatenate([wm, wi], axis=1),                # (G, M+D)
        b_all=jnp.concatenate([bq_f, bk, bg, bm, bi], axis=1),   # (1, 2D+G+M+D)
    )

    x = jax.random.normal(ks[7], (N, D), jnp.float32)
    # ONE packed uniform draw drives all three Bernoulli masks
    rand = jax.random.uniform(ks[8], (N, 2 * D + N), jnp.float32)

    forward = jax.jit(build_forward(cfg, debug=False))          # production
    forward_dbg = jax.jit(build_forward(cfg, debug=True))       # verification

    z, x_imp, loss_cl = forward(x, rand, packed)
    jax.block_until_ready((z, x_imp, loss_cl))
    z_d, x_imp_d, loss_d, adj = forward_dbg(x, rand, packed)
    jax.block_until_ready((z_d, x_imp_d, loss_d, adj))

    # ---- shape / structural checks ------------------------------------------
    assert z.shape == (N, G) and x_imp.shape == (N, D) and loss_cl.shape == ()
    assert bool(jnp.isfinite(loss_cl))
    adj_np = np.asarray(adj)
    assert np.all(np.diag(adj_np) == 0.0)
    assert np.all((adj_np == 0.0) | (adj_np == 1.0))

    # production and debug variants agree
    np.testing.assert_allclose(np.asarray(z), np.asarray(z_d), rtol=5e-3, atol=5e-3)
    np.testing.assert_allclose(np.asarray(x_imp), np.asarray(x_imp_d), rtol=5e-3, atol=5e-3)
    np.testing.assert_allclose(float(loss_cl), float(loss_d), rtol=5e-3, atol=5e-3)

    # ---- numerical check: replay the forward in plain JAX (HIGHEST matmul
    # precision), reusing the kernel's adjacency and the shared uniform draws --
    HI = lax.Precision.HIGHEST
    keep_drop = 1.0 - cfg["dropout"]
    keep_feat = 1.0 - cfg["prob_feature"]
    keep_edge = 1.0 - cfg["prob_edge"]
    drop_m = (rand[:, :D] < keep_drop).astype(jnp.float32)
    feat_m = (rand[:, D:2 * D] < keep_feat).astype(jnp.float32)
    edge_m = (rand[:, 2 * D:] < keep_edge).astype(jnp.float32)
    x_drop = x * drop_m / keep_drop
    x_aug = feat_m * x_drop
    adj_aug = edge_m * adj
    eye = jnp.eye(N, dtype=jnp.float32)

    # verify the Wo / 1/sqrt(d_k) fold against the original multi-head math
    qh = jnp.dot(x_drop, wq, precision=HI) + bq
    kh = jnp.dot(x_drop, wk, precision=HI) + bk
    s_orig = jnp.einsum("ihd,jhd->ijh", qh.reshape(N, H, d_k),
                        kh.reshape(N, H, d_k), precision=HI) / math.sqrt(d_k)
    s_orig = jnp.einsum("ijh,h->ij", s_orig, wo_w, precision=HI) + wo_b
    s_fold = jnp.dot(jnp.dot(x_drop, wq_f, precision=HI) + bq_f,
                     (jnp.dot(x_drop, wk, precision=HI) + bk).T,
                     precision=HI) + wo_b
    np.testing.assert_allclose(np.asarray(s_fold), np.asarray(s_orig),
                               rtol=1e-4, atol=1e-4)

    def gcn_ref(a, feat):
        ahat = a + eye
        deg = jnp.sum(ahat, axis=0)
        dinv = 1.0 / jnp.sqrt(deg)
        bmat = ahat * dinv[None, :] * dinv[:, None]
        xw = jnp.dot(feat, wg, precision=HI)
        return jnp.dot(bmat.T, xw, precision=HI) + bg

    z_ref = gcn_ref(adj, x_drop)
    z_aug_ref = gcn_ref(adj_aug, x_aug)
    x_imp_ref = jnp.dot(z_ref, wi, precision=HI) + bi
    z_mlp_ref = jnp.dot(z_ref, wm, precision=HI) + bm
    z_mlp_aug_ref = jnp.dot(z_aug_ref, wm, precision=HI) + bm

    def l2n(v):
        return v / jnp.maximum(jnp.linalg.norm(v, axis=1, keepdims=True), 1e-12)

    def cl_loss_ref(zm, zma, a):
        zn, zan = l2n(zm), l2n(zma)
        intra = jnp.exp(jnp.dot(zn, zn.T, precision=HI) / cfg["tau"])
        inter = jnp.exp(jnp.dot(zn, zan.T, precision=HI) / cfg["tau"])
        pos = jnp.diag(inter) + jnp.sum(intra * a, 1) + jnp.sum(inter * a, 1)
        den = jnp.sum(intra, 1) + jnp.sum(inter, 1) - jnp.diag(intra)
        cnt = jnp.sum(a, 1) * 2.0 + 1.0
        return -jnp.mean(jnp.log(pos / den) / cnt)

    loss_ref = (cfg["alpha"] * cl_loss_ref(z_mlp_ref, z_mlp_aug_ref, adj)
                + cfg["beta"] * cl_loss_ref(z_mlp_aug_ref, z_mlp_ref, adj_aug))

    np.testing.assert_allclose(np.asarray(z_d), np.asarray(z_ref),
                               rtol=5e-3, atol=5e-3)
    np.testing.assert_allclose(np.asarray(x_imp_d), np.asarray(x_imp_ref),
                               rtol=5e-3, atol=5e-3)
    np.testing.assert_allclose(float(loss_d), float(loss_ref),
                               rtol=5e-3, atol=5e-3)

    print("KERNEL_OK")
</pallas_src>

<mosaic_0001>
module attributes {stable_mosaic.version = 11 : i64} {
  func.func @_fused_forward_kernel(%arg0: memref<2xf32, #tpu.memory_space<smem>>, %arg1: memref<8x32xf32, #tpu.memory_space<vmem>>, %arg2: memref<8x72xf32, #tpu.memory_space<vmem>>, %arg3: memref<32x80xf32, #tpu.memory_space<vmem>>, %arg4: memref<16x48xf32, #tpu.memory_space<vmem>>, %arg5: memref<1x128xf32, #tpu.memory_space<vmem>>, %arg6: memref<8x16xf32, #tpu.memory_space<vmem>>, %arg7: memref<8x32xf32, #tpu.memory_space<vmem>>, %arg8: memref<1x1xf32, #tpu.memory_space<smem>>) attributes {dimension_semantics = [], scalar_prefetch = 0 : i64, scratch_operands = 0 : i64, tpu.core_type = #tpu.core_type<tc>} {
    %c0 = arith.constant 0 : index
    %0 = memref.load %arg0[%c0] : memref<2xf32, #tpu.memory_space<smem>>
    %c1 = arith.constant 1 : index
    %1 = memref.load %arg0[%c1] : memref<2xf32, #tpu.memory_space<smem>>
    %2 = tpu.iota {dimensions = array<i32: 0>} : vector<8x8xi32>
    %3 = tpu.iota {dimensions = array<i32: 1>} : vector<8x8xi32>
    %4 = arith.cmpi eq, %2, %3 : vector<8x8xi32>
    %cst = arith.constant 1.000000e+00 : f32
    %cst_0 = arith.constant 0.000000e+00 : f32
    %5 = vector.broadcast %cst : f32 to vector<8x8xf32>
    %6 = vector.broadcast %cst_0 : f32 to vector<8x8xf32>
    %7 = arith.select %4, %5, %6 : vector<8x8xi1>, vector<8x8xf32>
    %c0_1 = arith.constant 0 : index
    %c0_2 = arith.constant 0 : index
    %8 = vector.load %arg2[%c0_1, %c0_2] : memref<8x72xf32, #tpu.memory_space<vmem>>, vector<8x72xf32>
    %9 = vector.extract_strided_slice %8 {offsets = [0, 0], sizes = [8, 32], strides = [1, 1]} : vector<8x72xf32> to vector<8x32xf32>
    %cst_3 = arith.constant 0.899999976 : f32
    %10 = vector.broadcast %cst_3 : f32 to vector<8x32xf32>
    %11 = arith.cmpf olt, %9, %10 : vector<8x32xf32>
    %12 = arith.extui %11 : vector<8x32xi1> to vector<8x32xi32>
    %13 = arith.sitofp %12 : vector<8x32xi32> to vector<8x32xf32>
    %14 = vector.extract_strided_slice %8 {offsets = [0, 32], sizes = [8, 32], strides = [1, 1]} : vector<8x72xf32> to vector<8x32xf32>
    %cst_4 = arith.constant 8.000000e-01 : f32
    %15 = vector.broadcast %cst_4 : f32 to vector<8x32xf32>
    %16 = arith.cmpf olt, %14, %15 : vector<8x32xf32>
    %17 = arith.extui %16 : vector<8x32xi1> to vector<8x32xi32>
    %18 = arith.sitofp %17 : vector<8x32xi32> to vector<8x32xf32>
    %19 = vector.extract_strided_slice %8 {offsets = [0, 64], sizes = [8, 8], strides = [1, 1]} : vector<8x72xf32> to vector<8x8xf32>
    %cst_5 = arith.constant 8.000000e-01 : f32
    %20 = vector.broadcast %cst_5 : f32 to vector<8x8xf32>
    %21 = arith.cmpf olt, %19, %20 : vector<8x8xf32>
    %22 = arith.extui %21 : vector<8x8xi1> to vector<8x8xi32>
    %23 = arith.sitofp %22 : vector<8x8xi32> to vector<8x8xf32>
    %c0_6 = arith.constant 0 : index
    %c0_7 = arith.constant 0 : index
    %24 = vector.load %arg1[%c0_6, %c0_7] : memref<8x32xf32, #tpu.memory_space<vmem>>, vector<8x32xf32>
    %25 = arith.mulf %24, %13 : vector<8x32xf32>
    %cst_8 = arith.constant 1.11111116 : f32
    %26 = vector.broadcast %cst_8 : f32 to vector<8x32xf32>
    %27 = arith.mulf %25, %26 : vector<8x32xf32>
    %28 = arith.mulf %18, %27 : vector<8x32xf32>
    %c0_9 = arith.constant 0 : index
    %c0_10 = arith.constant 0 : index
    %29 = vector.load %arg5[%c0_9, %c0_10] : memref<1x128xf32, #tpu.memory_space<vmem>>, vector<1x128xf32>
    %30 = tpu.concatenate %27, %28 in 0 : vector<8x32xf32>, vector<8x32xf32> -> vector<16x32xf32>
    %c0_11 = arith.constant 0 : index
    %c0_12 = arith.constant 0 : index
    %31 = vector.load %arg3[%c0_11, %c0_12] : memref<32x80xf32, #tpu.memory_space<vmem>>, vector<32x80xf32>
    %cst_13 = arith.constant dense<0.000000e+00> : vector<16x80xf32>
    %32 = tpu.matmul %30, %31, %cst_13 {dimension_numbers = #tpu.dot_dimension_numbers<[1], [0], [0], [1], [0, 0, 1, 1], [], []>} : vector<16x32xf32>, vector<32x80xf32>, vector<16x80xf32> -> vector<16x80xf32>
    %33 = vector.extract_strided_slice %32 {offsets = [0, 0], sizes = [8, 32], strides = [1, 1]} : vector<16x80xf32> to vector<8x32xf32>
    %34 = vector.extract_strided_slice %29 {offsets = [0, 0], sizes = [1, 32], strides = [1, 1]} : vector<1x128xf32> to vector<1x32xf32>
    %35 = vector.broadcast %34 : vector<1x32xf32> to vector<8x32xf32>
    %36 = arith.addf %33, %35 : vector<8x32xf32>
    %37 = vector.extract_strided_slice %32 {offsets = [0, 32], sizes = [8, 32], strides = [1, 1]} : vector<16x80xf32> to vector<8x32xf32>
    %38 = vector.extract_strided_slice %29 {offsets = [0, 32], sizes = [1, 32], strides = [1, 1]} : vector<1x128xf32> to vector<1x32xf32>
    %39 = vector.broadcast %38 : vector<1x32xf32> to vector<8x32xf32>
    %40 = arith.addf %37, %39 : vector<8x32xf32>
    %41 = vector.extract_strided_slice %32 {offsets = [0, 64], sizes = [8, 16], strides = [1, 1]} : vector<16x80xf32> to vector<8x16xf32>
    %42 = vector.extract_strided_slice %32 {offsets = [8, 64], sizes = [8, 16], strides = [1, 1]} : vector<16x80xf32> to vector<8x16xf32>
    %cst_14 = arith.constant dense<0.000000e+00> : vector<8x8xf32>
    %43 = tpu.matmul %36, %40, %cst_14 {dimension_numbers = #tpu.dot_dimension_numbers<[1], [1], [0], [0], [0, 0, 1, 0], [], []>} : vector<8x32xf32>, vector<8x32xf32>, vector<8x8xf32> -> vector<8x8xf32>
    %44 = vector.broadcast %0 : f32 to vector<8x8xf32>
    %45 = arith.addf %43, %44 : vector<8x8xf32>
    %cst_15 = arith.constant dense<0xFF800000> : vector<8xf32>
    %46 = vector.multi_reduction <maximumf>, %45, %cst_15 [1] : vector<8x8xf32> to vector<8xf32>
    %47 = vector.shape_cast %46 : vector<8xf32> to vector<8x1xf32>
    %48 = vector.broadcast %47 : vector<8x1xf32> to vector<8x8xf32>
    %49 = arith.subf %45, %48 : vector<8x8xf32>
    %50 = math.exp %49 : vector<8x8xf32>
    %cst_16 = arith.constant dense<0.000000e+00> : vector<8xf32>
    %51 = vector.multi_reduction <add>, %50, %cst_16 [1] : vector<8x8xf32> to vector<8xf32>
    %52 = vector.shape_cast %51 : vector<8xf32> to vector<8x1xf32>
    %53 = vector.broadcast %52 : vector<8x1xf32> to vector<8x8xf32>
    %54 = arith.divf %50, %53 : vector<8x8xf32>
    %55 = vector.broadcast %1 : f32 to vector<8x8xf32>
    %56 = arith.cmpf oge, %54, %55 : vector<8x8xf32>
    %cst_17 = arith.constant 1.000000e+00 : f32
    %cst_18 = arith.constant 0.000000e+00 : f32
    %57 = vector.broadcast %cst_17 : f32 to vector<8x8xf32>
    %58 = vector.broadcast %cst_18 : f32 to vector<8x8xf32>
    %59 = arith.select %56, %57, %58 : vector<8x8xi1>, vector<8x8xf32>
    %cst_19 = arith.constant 1.000000e+00 : f32
    %60 = vector.broadcast %cst_19 : f32 to vector<8x8xf32>
    %61 = arith.subf %60, %7 : vector<8x8xf32>
    %62 = arith.mulf %59, %61 : vector<8x8xf32>
    %63 = arith.mulf %23, %62 : vector<8x8xf32>
    %cst_20 = arith.constant 1.000000e+00 : f32
    %64 = vector.broadcast %cst_20 : f32 to vector<8x1xf32>
    %65 = vector.extract_strided_slice %29 {offsets = [0, 64], sizes = [1, 16], strides = [1, 1]} : vector<1x128xf32> to vector<1x16xf32>
    %66 = arith.addf %62, %7 : vector<8x8xf32>
    %cst_21 = arith.constant dense<0.000000e+00> : vector<8x1xf32>
    %67 = tpu.matmul %66, %64, %cst_21 {dimension_numbers = #tpu.dot_dimension_numbers<[0], [0], [1], [1], [0, 1, 1, 1], [], []>} : vector<8x8xf32>, vector<8x1xf32>, vector<8x1xf32> -> vector<8x1xf32>
    %68 = math.rsqrt %67 : vector<8x1xf32>
    %69 = vector.broadcast %68 : vector<8x1xf32> to vector<8x16xf32>
    %70 = arith.mulf %41, %69 : vector<8x16xf32>
    %cst_22 = arith.constant dense<0.000000e+00> : vector<8x16xf32>
    %71 = tpu.matmul %66, %70, %cst_22 {dimension_numbers = #tpu.dot_dimension_numbers<[0], [0], [1], [1], [0, 1, 1, 1], [], []>} : vector<8x8xf32>, vector<8x16xf32>, vector<8x16xf32> -> vector<8x16xf32>
    %72 = vector.broadcast %68 : vector<8x1xf32> to vector<8x16xf32>
    %73 = arith.mulf %71, %72 : vector<8x16xf32>
    %74 = vector.broadcast %65 : vector<1x16xf32> to vector<8x16xf32>
    %75 = arith.addf %73, %74 : vector<8x16xf32>
    %76 = arith.addf %63, %7 : vector<8x8xf32>
    %cst_23 = arith.constant dense<0.000000e+00> : vector<8x1xf32>
    %77 = tpu.matmul %76, %64, %cst_23 {dimension_numbers = #tpu.dot_dimension_numbers<[0], [0], [1], [1], [0, 1, 1, 1], [], []>} : vector<8x8xf32>, vector<8x1xf32>, vector<8x1xf32> -> vector<8x1xf32>
    %78 = math.rsqrt %77 : vector<8x1xf32>
    %79 = vector.broadcast %78 : vector<8x1xf32> to vector<8x16xf32>
    %80 = arith.mulf %42, %79 : vector<8x16xf32>
    %cst_24 = arith.constant dense<0.000000e+00> : vector<8x16xf32>
    %81 = tpu.matmul %76, %80, %cst_24 {dimension_numbers = #tpu.dot_dimension_numbers<[0], [0], [1], [1], [0, 1, 1, 1], [], []>} : vector<8x8xf32>, vector<8x16xf32>, vector<8x16xf32> -> vector<8x16xf32>
    %82 = vector.broadcast %78 : vector<8x1xf32> to vector<8x16xf32>
    %83 = arith.mulf %81, %82 : vector<8x16xf32>
    %84 = vector.broadcast %65 : vector<1x16xf32> to vector<8x16xf32>
    %85 = arith.addf %83, %84 : vector<8x16xf32>
    %86 = tpu.concatenate %75, %85 in 0 : vector<8x16xf32>, vector<8x16xf32> -> vector<16x16xf32>
    %c0_25 = arith.constant 0 : index
    %c0_26 = arith.constant 0 : index
    %87 = vector.load %arg4[%c0_25, %c0_26] : memref<16x48xf32, #tpu.memory_space<vmem>>, vector<16x48xf32>
    %cst_27 = arith.constant dense<0.000000e+00> : vector<16x48xf32>
    %88 = tpu.matmul %86, %87, %cst_27 {dimension_numbers = #tpu.dot_dimension_numbers<[1], [0], [0], [1], [0, 0, 1, 1], [], []>} : vector<16x16xf32>, vector<16x48xf32>, vector<16x48xf32> -> vector<16x48xf32>
    %89 = vector.extract_strided_slice %88 {offsets = [0, 16], sizes = [8, 32], strides = [1, 1]} : vector<16x48xf32> to vector<8x32xf32>
    %90 = vector.extract_strided_slice %29 {offsets = [0, 96], sizes = [1, 32], strides = [1, 1]} : vector<1x128xf32> to vector<1x32xf32>
    %91 = vector.broadcast %90 : vector<1x32xf32> to vector<8x32xf32>
    %92 = arith.addf %89, %91 : vector<8x32xf32>
    %93 = vector.extract_strided_slice %88 {offsets = [0, 0], sizes = [16, 16], strides = [1, 1]} : vector<16x48xf32> to vector<16x16xf32>
    %94 = vector.extract_strided_slice %29 {offsets = [0, 80], sizes = [1, 16], strides = [1, 1]} : vector<1x128xf32> to vector<1x16xf32>
    %95 = vector.broadcast %94 : vector<1x16xf32> to vector<16x16xf32>
    %96 = arith.addf %93, %95 : vector<16x16xf32>
    %97 = arith.mulf %96, %96 : vector<16x16xf32>
    %cst_28 = arith.constant dense<0.000000e+00> : vector<16xf32>
    %98 = vector.multi_reduction <add>, %97, %cst_28 [1] : vector<16x16xf32> to vector<16xf32>
    %99 = vector.shape_cast %98 : vector<16xf32> to vector<16x1xf32>
    %cst_29 = arith.constant 1.000000e-24 : f32
    %100 = vector.broadcast %cst_29 : f32 to vector<16x1xf32>
    %101 = arith.addf %99, %100 : vector<16x1xf32>
    %102 = math.rsqrt %101 : vector<16x1xf32>
    %103 = vector.broadcast %102 : vector<16x1xf32> to vector<16x16xf32>
    %104 = arith.mulf %96, %103 : vector<16x16xf32>
    %cst_30 = arith.constant dense<0.000000e+00> : vector<16x16xf32>
    %105 = tpu.matmul %104, %104, %cst_30 {dimension_numbers = #tpu.dot_dimension_numbers<[1], [1], [0], [0], [0, 0, 1, 0], [], []>} : vector<16x16xf32>, vector<16x16xf32>, vector<16x16xf32> -> vector<16x16xf32>
    %cst_31 = arith.constant 2.000000e+00 : f32
    %106 = vector.broadcast %cst_31 : f32 to vector<16x16xf32>
    %107 = arith.mulf %105, %106 : vector<16x16xf32>
    %108 = math.exp %107 : vector<16x16xf32>
    %109 = vector.extract_strided_slice %104 {offsets = [0, 0], sizes = [8, 16], strides = [1, 1]} : vector<16x16xf32> to vector<8x16xf32>
    %110 = vector.extract_strided_slice %104 {offsets = [8, 0], sizes = [8, 16], strides = [1, 1]} : vector<16x16xf32> to vector<8x16xf32>
    %111 = arith.mulf %109, %110 : vector<8x16xf32>
    %cst_32 = arith.constant dense<0.000000e+00> : vector<8xf32>
    %112 = vector.multi_reduction <add>, %111, %cst_32 [1] : vector<8x16xf32> to vector<8xf32>
    %113 = vector.shape_cast %112 : vector<8xf32> to vector<8x1xf32>
    %cst_33 = arith.constant 2.000000e+00 : f32
    %114 = vector.broadcast %cst_33 : f32 to vector<8x1xf32>
    %115 = arith.mulf %113, %114 : vector<8x1xf32>
    %116 = math.exp %115 : vector<8x1xf32>
    %117 = tpu.concatenate %116, %116 in 0 : vector<8x1xf32>, vector<8x1xf32> -> vector<16x1xf32>
    %118 = tpu.concatenate %62, %63 in 0 : vector<8x8xf32>, vector<8x8xf32> -> vector<16x8xf32>
    %119 = vector.extract_strided_slice %108 {offsets = [0, 0], sizes = [16, 8], strides = [1, 1]} : vector<16x16xf32> to vector<16x8xf32>
    %120 = vector.extract_strided_slice %108 {offsets = [0, 8], sizes = [16, 8], strides = [1, 1]} : vector<16x16xf32> to vector<16x8xf32>
    %121 = arith.addf %119, %120 : vector<16x8xf32>
    %122 = arith.mulf %121, %118 : vector<16x8xf32>
    %cst_34 = arith.constant dense<0.000000e+00> : vector<16xf32>
    %123 = vector.multi_reduction <add>, %122, %cst_34 [1] : vector<16x8xf32> to vector<16xf32>
    %124 = vector.shape_cast %123 : vector<16xf32> to vector<16x1xf32>
    %125 = arith.addf %117, %124 : vector<16x1xf32>
    %cst_35 = arith.constant dense<0.000000e+00> : vector<16xf32>
    %126 = vector.multi_reduction <add>, %108, %cst_35 [1] : vector<16x16xf32> to vector<16xf32>
    %127 = vector.shape_cast %126 : vector<16xf32> to vector<16x1xf32>
    %cst_36 = arith.constant 7.3890562 : f32
    %128 = vector.broadcast %cst_36 : f32 to vector<16x1xf32>
    %129 = arith.subf %127, %128 : vector<16x1xf32>
    %cst_37 = arith.constant dense<0.000000e+00> : vector<16xf32>
    %130 = vector.multi_reduction <add>, %118, %cst_37 [1] : vector<16x8xf32> to vector<16xf32>
    %131 = vector.shape_cast %130 : vector<16xf32> to vector<16x1xf32>
    %cst_38 = arith.constant 2.000000e+00 : f32
    %132 = vector.broadcast %cst_38 : f32 to vector<16x1xf32>
    %133 = arith.mulf %132, %131 : vector<16x1xf32>
    %cst_39 = arith.constant 1.000000e+00 : f32
    %134 = vector.broadcast %cst_39 : f32 to vector<16x1xf32>
    %135 = arith.addf %133, %134 : vector<16x1xf32>
    %136 = arith.divf %125, %129 : vector<16x1xf32>
    %137 = math.log %136 : vector<16x1xf32>
    %138 = arith.divf %137, %135 : vector<16x1xf32>
    %139 = vector.extract_strided_slice %138 {offsets = [0, 0], sizes = [8, 1], strides = [1, 1]} : vector<16x1xf32> to vector<8x1xf32>
    %140 = vector.shape_cast %139 : vector<8x1xf32> to vector<1x8x1xf32>
    %cst_40 = arith.constant dense<0.000000e+00> : vector<1xf32>
    %141 = vector.multi_reduction <add>, %140, %cst_40 [1, 2] : vector<1x8x1xf32> to vector<1xf32>
    %142 = vector.shape_cast %141 : vector<1xf32> to vector<1x1x1xf32>
    %143 = vector.extract %142[0, 0, 0] : f32 from vector<1x1x1xf32>
    %cst_41 = arith.constant 0.000000e+00 : f32
    %144 = arith.subf %cst_41, %143 : f32
    %cst_42 = arith.constant 1.250000e-01 : f32
    %145 = arith.mulf %144, %cst_42 : f32
    %146 = vector.extract_strided_slice %138 {offsets = [8, 0], sizes = [8, 1], strides = [1, 1]} : vector<16x1xf32> to vector<8x1xf32>
    %147 = vector.shape_cast %146 : vector<8x1xf32> to vector<1x8x1xf32>
    %cst_43 = arith.constant dense<0.000000e+00> : vector<1xf32>
    %148 = vector.multi_reduction <add>, %147, %cst_43 [1, 2] : vector<1x8x1xf32> to vector<1xf32>
    %149 = vector.shape_cast %148 : vector<1xf32> to vector<1x1x1xf32>
    %150 = vector.extract %149[0, 0, 0] : f32 from vector<1x1x1xf32>
    %cst_44 = arith.constant 0.000000e+00 : f32
    %151 = arith.subf %cst_44, %150 : f32
    %cst_45 = arith.constant 1.250000e-01 : f32
    %152 = arith.mulf %151, %cst_45 : f32
    %c0_46 = arith.constant 0 : index
    %c0_47 = arith.constant 0 : index
    %153 = vector.load %arg6[%c0_46, %c0_47] : memref<8x16xf32, #tpu.memory_space<vmem>>, vector<8x16xf32>
    tpu.vector_store %arg6[%c0_46, %c0_47], %75 {strides = array<i32>} : memref<8x16xf32, #tpu.memory_space<vmem>>, vector<8x16xf32>,
    %c0_48 = arith.constant 0 : index
    %c0_49 = arith.constant 0 : index
    %154 = vector.load %arg7[%c0_48, %c0_49] : memref<8x32xf32, #tpu.memory_space<vmem>>, vector<8x32xf32>
    tpu.vector_store %arg7[%c0_48, %c0_49], %92 {strides = array<i32>} : memref<8x32xf32, #tpu.memory_space<vmem>>, vector<8x32xf32>,
    %cst_50 = arith.constant 5.000000e-01 : f32
    %155 = arith.mulf %cst_50, %145 : f32
    %cst_51 = arith.constant 5.000000e-01 : f32
    %156 = arith.mulf %cst_51, %152 : f32
    %157 = arith.addf %155, %156 : f32
    %c0_52 = arith.constant 0 : index
    %c0_53 = arith.constant 0 : index
    %158 = memref.load %arg8[%c0_52, %c0_53] : memref<1x1xf32, #tpu.memory_space<smem>>
    memref.store %157, %arg8[%c0_52, %c0_53] : memref<1x1xf32, #tpu.memory_space<smem>>
    return
  }
}

</mosaic_0001>

<bundles_post_ra>
// kernel: forward.1
= control target key start
LH: loop header
LB: loop body
LE: loop exit
PB: predicated region body
PF: predicated region fallthrough
CT: control target
= control target key end

     0   :  { %14 = vsyncpa [#allocation6], 0  ;;  %s1615_s0 = inlined_call_operand.vmem [shape: f32[2], index: 0, kind: input, shape index: {}]   ;;  %s1616_s1 = inlined_call_operand.hbm [shape: f32[8,32], index: 1, kind: input, shape index: {}]   ;;  %s1617_s2 = inlined_call_operand.hbm [shape: f32[8,72], index: 2, kind: input, shape index: {}]   ;;  %s1618_s3 = inlined_call_operand.hbm [shape: f32[32,80], index: 3, kind: input, shape index: {}]   ;;  %s1619_s4 = inlined_call_operand.hbm [shape: f32[16,48], index: 4, kind: input, shape index: {}]   ;;  %s1620_s5 = inlined_call_operand.vmem [shape: f32[1,128], index: 5, kind: input, shape index: {}]   ;;  %s1621_s6 = inlined_call_operand.hbm [shape: f32[8,16], index: 6, kind: output, shape index: {0}]   ;;  %s1622_s7 = inlined_call_operand.hbm [shape: f32[8,32], index: 7, kind: output, shape index: {1}]   ;;  %s1623_s8 = inlined_call_operand.hbm [shape: f32[1,1], index: 8, kind: output, shape index: {2}]  }
   0x1   :  { %15 = vsyncpa [#allocation3], 0 }
   0x2   :  { %16 = vsyncpa [#allocation9], 0 }
   0x3   :  { %17 = vsyncpa [#allocation12], 0 }
   0x4   :  { %18 = vsyncpa [#allocation4], 0 }
   0x5   :  { %19 = vsyncpa [#allocation15], 0 }
   0x6   :  { %20 = vsyncpa [#allocation5], 0  ;;  %s27_s29 = sshll.u32 %s1615_s0, 4  ;;  %s1368_s30 = smov [#allocation8]   ;;  %s28_s29 = int_to_ptr.vmem [resolvable:$true] %s27_s29 }
   0x7   :  { %s47_s9 = sshll.u32 %s1368_s30, 4  ;;  %s1200_s12 = scalar_lea.hbm %s1617_s2, 128  ;;  %s48_s9 = int_to_ptr.vmem [resolvable:$true] %s47_s9 }
   0x8   :  { %p1201_p0 = scmp.ne.s32.totalorder %s1617_s2, %s1200_s12  ;;  %p1204_p1 = scmp.lt.u32.totalorder %s1200_s12, %s1617_s2 }
   0xa   :  { %p1206_p2 = pnand %p1204_p1, %p1201_p0 }
   0xc   :  { %1209 = shalt.err (!%p1206_p2)
}
   0xd   :  { %s1210_s17 = scalar_lea.vmem %s48_s9, 128  ;;  %p1215_p4 = scmp.lt.s32.totalorder %s48_s9, %s48_s9 }
   0xe   :  { %p1211_p3 = scmp.ne.s32.totalorder %s48_s9, %s1210_s17  ;;  %p1216_p5 = scmp.lt.s32.totalorder %s1210_s17, %s1210_s17 }
  0x10   :  { %p1217_p6 = por %p1216_p5, %p1215_p4 }
  0x12   :  { %p1218_p7 = pnand %p1217_p6, %p1211_p3 }
  0x14   :  { %1221 = shalt.err (!%p1218_p7)
}
  0x15   :  { %50 = dma.hbm_to_vmem [thread:$0]  %s1617_s2, 128, %s48_s9, [#allocation9]  }
  0x16   :  { %s1222_s19 = scalar_lea.vmem %s28_s29, 16  ;;  %p1227_p9 = scmp.lt.s32.totalorder %s28_s29, %s28_s29 }
  0x17   :  { %p1223_p8 = scmp.ne.s32.totalorder %s28_s29, %s1222_s19  ;;  %p1228_p10 = scmp.lt.s32.totalorder %s1222_s19, %s1222_s19 }
  0x19   :  { %p1229_p11 = por %p1228_p10, %p1227_p9 }
  0x1b   :  { %p1230_p12 = pnand %p1229_p11, %p1223_p8 }
  0x1d   :  { %1233 = shalt.err (!%p1230_p12)
}
  0x1e   :  { %s1369_s20 = smov [#allocation2]   ;;  %s1370_s21 = smov [#allocation7]  }
  0x1f   :  { %30 = dma.vmem_to_smem %s28_s29, 16, %s1369_s20, [#allocation6]  }
  0x20   :  { %s37_s22 = sshll.u32 %s1370_s21, 4  ;;  %s1371_s23 = smov [#allocation10]   ;;  %s38_s22 = int_to_ptr.vmem [resolvable:$true] %s37_s22 }
  0x21   :  { %s56_s24 = sshll.u32 %s1371_s23, 4  ;;  %s1234_s2 = scalar_lea.hbm %s1616_s1, 128  ;;  %s1448_s24 = int_to_ptr.vmem [resolvable:$true] %s56_s24 }
  0x22   :  { %p1235_p13 = scmp.ne.s32.totalorder %s1616_s1, %s1234_s2  ;;  %p1238_p0 = scmp.lt.u32.totalorder %s1234_s2, %s1616_s1 }
  0x24   :  { %p1240_p1 = pnand %p1238_p0, %p1235_p13 }
  0x26   :  { %1243 = shalt.err (!%p1240_p1)
}
  0x27   :  { %s1244_s29 = scalar_lea.vmem %s38_s22, 128  ;;  %p1249_p3 = scmp.lt.s32.totalorder %s38_s22, %s38_s22 }
  0x28   :  { %p1245_p2 = scmp.ne.s32.totalorder %s38_s22, %s1244_s29  ;;  %p1250_p4 = scmp.lt.s32.totalorder %s1244_s29, %s1244_s29 }
  0x2a   :  { %p1251_p5 = por %p1250_p4, %p1249_p3 }
  0x2c   :  { %p1252_p6 = pnand %p1251_p5, %p1245_p2 }
  0x2e   :  { %1255 = shalt.err (!%p1252_p6)
}
  0x2f   :  { %40 = dma.hbm_to_vmem [thread:$0]  %s1616_s1, 128, %s38_s22, [#allocation3]  }
  0x30   :  { %s1256_s14 = scalar_lea.hbm %s1618_s3, 512 }
  0x31   :  { %p1257_p7 = scmp.ne.s32.totalorder %s1618_s3, %s1256_s14  ;;  %p1260_p8 = scmp.lt.u32.totalorder %s1256_s14, %s1618_s3 }
  0x33   :  { %p1262_p9 = pnand %p1260_p8, %p1257_p7 }
  0x35   :  { %1265 = shalt.err (!%p1262_p9)
}
  0x36   :  { %s1266_s18 = scalar_lea.vmem %s1448_s24, 512  ;;  %p1271_p11 = scmp.lt.s32.totalorder %s1448_s24, %s1448_s24 }
  0x37   :  { %p1267_p10 = scmp.ne.s32.totalorder %s1448_s24, %s1266_s18  ;;  %p1272_p12 = scmp.lt.s32.totalorder %s1266_s18, %s1266_s18 }
  0x39   :  { %p1273_p13 = por %p1272_p12, %p1271_p11 }
  0x3b   :  { %p1274_p0 = pnand %p1273_p13, %p1267_p10 }
  0x3d   :  { %1277 = shalt.err (!%p1274_p0)
}
  0x3e   :  { %s1372_s1 = smov 128   ;;  %s1373_s19 = smov 8  }
  0x3f   :  { %62 = dma.hbm_to_vmem [thread:$0]  %s1618_s3, 512, %s1448_s24, [#allocation9], %s1372_s1, %s1372_s1, %s1373_s19  }
  0x40   :  { %s1374_s22 = smov [#allocation11]   ;;  %s1278_s2 = scalar_lea.hbm %s1619_s4, 256 }
  0x41   :  { %s68_s23 = sshll.u32 %s1374_s22, 4  ;;  %p1279_p1 = scmp.ne.s32.totalorder %s1619_s4, %s1278_s2  ;;  %s69_s23 = int_to_ptr.vmem [resolvable:$true] %s68_s23 }
  0x42   :  { %p1282_p2 = scmp.lt.u32.totalorder %s1278_s2, %s1619_s4 }
  0x44   :  { %p1284_p3 = pnand %p1282_p2, %p1279_p1 }
  0x46   :  { %1287 = shalt.err (!%p1284_p3)
}
  0x47   :  { %s1288_s29 = scalar_lea.vmem %s69_s23, 256  ;;  %p1293_p5 = scmp.lt.s32.totalorder %s69_s23, %s69_s23 }
  0x48   :  { %p1289_p4 = scmp.ne.s32.totalorder %s69_s23, %s1288_s29  ;;  %p1294_p6 = scmp.lt.s32.totalorder %s1288_s29, %s1288_s29 }
  0x4a   :  { %p1295_p7 = por %p1294_p6, %p1293_p5 }
  0x4c   :  { %p1296_p8 = pnand %p1295_p7, %p1289_p4 }
  0x4e   :  { %1299 = shalt.err (!%p1296_p8)
}
  0x4f   :  { %74 = dma.hbm_to_vmem [thread:$0]  %s1619_s4, 256, %s69_s23, [#allocation12], %s1372_s1, %s1372_s1, %s1373_s19  }
  0x50   :  { %1354 = dma.done.wait [#allocation6], 16  }
  0x51   :  { %1355 = vsyncadd [#allocation6], 4294967280 }
  0x52   :  { %1356 = dma.done.wait [#allocation3], 128  }
  0x53   :  { %1357 = vsyncadd [#allocation3], 4294967168 }
  0x54   :  { %1358 = dma.done.wait [#allocation9], 640  }
  0x55   :  { %1359 = vsyncadd [#allocation9], 4294966656 }
  0x56   :  { %1360 = dma.done.wait [#allocation12], 256  }
  0x57   :  { %1361 = vsyncadd [#allocation12], 4294967040 }
  0x58   :  { %92 = sfence }
  0x59   :  { %v101_v0 = vld [vmem:[#allocation8] sm:$0xff]  ;;  %v108_v1 = vld [vmem:[#allocation7] sm:$0xff]  ;;  %v120_v2 = vld [vmem:[#allocation10] sm:$0xff]  ;;  %v1375_v5 = vmov 0.0   ;;  %s1376_s4 = smov 32   ;;  %vm124_vm1 = vcmask 261120   ;;  %v95_v31 = vlaneseq }
  0x5a   :  { %vm102_vm0 = vcmp.lt.f32.partialorder %v101_v0, 0.9  ;;  %v121_v3 = vld [vmem:[#allocation10 + $0x8] sm:$0xff]  ;;  %v122_v4 = vld [vmem:[#allocation10 + $0x10] sm:$0xff]  ;;  %1087 = vmatprep.subr.mxu1 %v1375_v5  ;;  %v123_v8 = vld [vmem:[#allocation10 + $0x18] sm:$0xff]  ;;  %s1377_s10 = smov 96  }
  0x5b   :  { %v1033_v6 = vsel %vm102_vm0, 1.0, %v1375_v5  ;;  %v1126_v7 = vpack.c.bf16 %v121_v3, %v120_v2  ;;  %v1130_v10 = vpack.c.bf16 %v123_v8, %v122_v4  ;;  %vm105_vm2 = vcmp.lt.f32.partialorder %v101_v0, 0.8  ;;  %v1507_v16 = vld [vmem:[%s1620_s5] ss:$0 sm:$0xff]  ;;  %s93_s5 = sld [smem:[#allocation2]] }
  0x5c   :  { %v109_v9 = vmul.f32 %v1033_v6, %v108_v1  ;;  %v1496_v12 = vsel %vm105_vm2, 1.0, %v1375_v5  ;;  %vm1378_vm3 = vmmov 0   ;;  %vm289_vm4 = vcmask 64512   ;;  %s1032_s13 = sld [smem:[#allocation2 + $0x1]]  ;;  %s1380_s14 = smov 64   ;;  %v701_v6 = vld [vmem:[#allocation11 + $0x8] sm:$0xff] }
  0x5d   :  { %1127 = vmatprep.subr.bf16.mxu0 %v1126_v7  ;;  %1089 = vmatprep.mubr.msk.f32.mxu1 %vm1378_vm3, %v1375_v5  ;;  %v96_v33 = vshrl.u32 %v95_v31, 7  ;;  %v98_v34 = vand.u32 127, %v95_v31  ;;  %v1379_v36 = vmov 1.0   ;;  %v1381_v45 = vmov 0   ;;  %s1382_s15 = smov 48   ;;  %s1383_s16 = smov 120  }
  0x5e   :  { %v110_v11 = vmul.f32 1.1111112, %v109_v9  ;;  %1129 = vmatpush3.bf16.msra.mxu0 %v1126_v7  ;;  %1168 = vset.pattern.permute.xlu1 %v1381_v45  ;;  %vm702_vm7 = vcmask 130048   ;;  %vm951_vm9 = vcmask 7168   ;;  %s1384_s17 = smov 112   ;;  %s1385_s0 = smov [#allocation13]  }
  0x5f   :  { %1131 = vmatprep.subr.bf16.mxu0 %v1130_v10  ;;  %vm99_vm5 = vcmp.eq.s32.totalorder %v96_v33, %v98_v34  ;;  %vm1139_vm8 = vmpackc.low %vm702_vm7, %vm702_vm7  ;;  %s993_s18 = sshll.u32 %s1385_s0, 4  ;;  %s994_s18 = int_to_ptr.vmem [resolvable:$true] %s993_s18 }
  0x60   :  { %112 = vrot.lane.b32.xlu0 %v110_v11, %s1376_s4  ;;  %1084 = vmatprep.mubr.msk.f32.mxu0 %vm124_vm1, %v110_v11  ;;  %v100_v35 = vsel %vm99_vm5, 1.0, %v1375_v5  ;;  %s1300_s1 = scalar_lea.vmem %s994_s18, 128  ;;  %p1305_p10 = scmp.lt.s32.totalorder %s994_s18, %s994_s18 }
  0x61   :  { %v211_v21 = vstv %s93_s5  ;;  %v304_v40 = vsub.f32 1.0, %v100_v35  ;;  %p1301_p9 = scmp.ne.s32.totalorder %s994_s18, %s1300_s1  ;;  %p1306_p11 = scmp.lt.s32.totalorder %s1300_s1, %s1300_s1 }
  0x62   :  { %1133 = vmatpush3.bf16.msra.mxu0 %v1130_v10  ;;  %v301_v38 = vstv %s1032_s13 }
  0x63   :  { %1107 = vmatprep.subr.mxu0 %v1375_v5  ;;  %p1307_p12 = por %p1306_p11, %p1305_p10 }
  0x65   :  { %p1308_p13 = pnand %p1307_p12, %p1301_p9 }
  0xd2   :  { %v113_v13 = vpop.permute.xlu0 %112 }
  0xd3   :  { %v115_v14 = vmul.f32 %v1496_v12, %v113_v13 }
  0xd5   :  { %118 = vrot.lane.b32.xlu0 %v115_v14, %s1377_s10 }
 0x147   :  { %v119_v15 = vpop.permute.xlu0 %118 }
 0x148   :  { %1085 = vmatmul.mubr.msk.f32.vlgmr.msra.gmra.mrb[0].mxu0 %vm124_vm1, %v119_v15 }
 0x149   :  { %1109 = vmatprep.mubr.msk.f32.mxu0 %vm1378_vm3, %v1375_v5 }
 0x21b   :  { %v1509_v17 = vpop.f32.mrb[0].mxu0 }
 0x21c   :  { %v1511_v18 = vpop.f32.mrb[1].mxu0 }
 0x21d   :  { %v210_v19 = vadd.f32 %v1507_v16, %v1511_v18 }
 0x21f   :  { %213 = vrot.lane.b32.xlu1 %v210_v19, %s1377_s10 }
 0x291   :  { %v214_v20 = vpop.permute.xlu1 %213 }
 0x292   :  { %1088 = vmatpush3.xpose.msk.msra.mxu1 %vm124_vm1, %v214_v20 }
 0x293   :  { %1092 = vmatprep.subr.mxu1 %v1375_v5 }
 0x295   :  { %1090 = vmatmul.mubr.msk.f32.vlgmr.msra.gmra.mrb[0].mxu1 %vm124_vm1, %v210_v19 }
 0x296   :  { %1094 = vmatprep.mubr.msk.f32.mxu1 %vm1378_vm3, %v1375_v5  ;;  %1093 = vmatpush3.msra.mxu1 %v1379_v36 }
 0x297   :  { %1097 = vmatprep.subr.mxu1 %v1375_v5 }
 0x368   :  { %v285_v22 = vpop.f32.mrb[0].mxu1 }
 0x369   :  { %v286_v23 = vadd.f32 %v285_v22, %v211_v21  ;;  %v1091_v24 = vpop.f32.mrb[1].mxu1 }
 0x36b   :  { %v290_v25 = vsel %vm289_vm4, %v286_v23, -inf }
 0x36c   :  { %291 = vmax.xlane.f32.xlu1 %v290_v25 }
 0x3f9   :  { %v292_v26 = vpop.xlane.xlu1 %291 }
 0x3fa   :  { %v293_v27 = vsub.f32 %v286_v23, %v292_v26 }
 0x3fc   :  { %v294_v28 = vmul.f32 1.442695, %v293_v27 }
 0x3fe   :  { %1170 = vpow2.f32 %v294_v28 }
 0x408   :  { %v1171_v29 = vpop.eup %1170 }
 0x409   :  { %v296_v30 = vsel %vm289_vm4, %v1171_v29, 0.0 }
 0x40a   :  { %297 = vadd.xlane.f32.xlu0 %v296_v30 }
 0x497   :  { %v298_v32 = vpop.xlane.xlu0 %297 }
 0x498   :  { %1172 = vrcp.f32 %v298_v32 }
 0x4a2   :  { %v1173_v37 = vpop.eup %1172 }
 0x4a3   :  { %v300_v39 = vmul.f32 %v1173_v37, %v1171_v29 }
 0x4a5   :  { %vm302_vm6 = vcmp.ge.f32.partialorder %v300_v39, %v301_v38 }
 0x4a6   :  { %v303_v41 = vsel %vm302_vm6, 1.0, %v1375_v5 }
 0x4a7   :  { %v1525_v42 = vmul.f32 %v304_v40, %v303_v41 }
 0x4a9   :  { %307 = vrot.lane.b32.xlu1 %v1525_v42, %s1380_s14  ;;  %v311_v43 = vadd.f32 %v1525_v42, %v100_v35 }
 0x4ab   :  { %312 = vxpose.xlu0.b32.start.end [1/1] (short) (narrow) %v311_v43, 8 }
 0x4ad   :  { %504 = vrot.lane.b32.xlu1 %v100_v35, %s1380_s14 }
 0x4d4   :  { %1169 = vset.pattern.permute.xlu0 %v1381_v45 }
 0x51b   :  { %v308_v48 = vpop.permute.xlu1 %307 }
 0x51c   :  { %v1535_v51 = vmul.f32 %v1496_v12, %v308_v48 }
 0x51f   :  { %v505_v50 = vpop.permute.xlu1 %504 }
 0x520   :  { %v507_v52 = vadd.f32 %v505_v50, %v1535_v51 }
 0x52b   :  { %v328_v44 = vpop.trf.xlu0 }
 0x52c   :  { %1095 = vmatmul.mubr.msk.f32.vlgmr.msra.gmra.mrb[2].mxu1 %vm289_vm4, %v328_v44 }
 0x52d   :  { %1099 = vmatprep.mubr.msk.f32.mxu1 %vm1378_vm3, %v1375_v5 }
 0x5ff   :  { %v413_v46 = vpop.f32.mrb[2].mxu1 }
 0x600   :  { %1174 = vrsqrt.f32 %v413_v46  ;;  %v1096_v47 = vpop.f32.mrb[3].mxu1 }
 0x60a   :  { %v1175_v49 = vpop.eup %1174 }
 0x60b   :  { %420 = vperm.xlu1 %1168, %v1175_v49  }
 0x60f   :  { %509 = vrot.lane.b32.xlu1 %v507_v52, %s1380_s14 }
 0x68a   :  { %v421_v53 = vpop.permute.xlu1 %420 }
 0x68b   :  { %v423_v54 = vmul.f32 %v421_v53, %v1511_v18 }
 0x68d   :  { %425 = vrot.lane.b32.xlu1 %v423_v54, %s1380_s14 }
 0x68e   :  { %v510_v55 = vpop.permute.xlu1 %509 }
 0x6b6   :  { %512 = vxpose.xlu1.b32.start.end [1/1] (short) (narrow) %v510_v55, 8 }
 0x6ff   :  { %v426_v56 = vpop.permute.xlu1 %425 }
 0x700   :  { %1098 = vmatpush3.msra.mxu1 %v426_v56 }
 0x701   :  { %1100 = vmatmul.mubr.msk.f32.vlgmr.msra.gmra.mrb[4].mxu1 %vm289_vm4, %v328_v44  ;;  %1102 = vmatprep.subr.mxu1 %v1375_v5 }
 0x702   :  { %1103 = vmatpush3.msra.mxu1 %v1379_v36  ;;  %1104 = vmatprep.mubr.msk.f32.mxu1 %vm1378_vm3, %v1375_v5  ;;  %v700_v5 = vld [vmem:[#allocation11] sm:$0xff] }
 0x703   :  { %v1134_v7 = vpack.c.bf16 %v701_v6, %v700_v5 }
 0x705   :  { %1135 = vmatprep.subr.bf16.mxu1 %v1134_v7 }
 0x736   :  { %v528_v57 = vpop.trf.xlu1 }
 0x737   :  { %1105 = vmatmul.mubr.msk.f32.vlgmr.msra.gmra.mrb[6].mxu1 %vm289_vm4, %v528_v57 }
 0x738   :  { %1137 = vmatpush3.bf16.msra.mxu1 %v1134_v7 }
 0x7d4   :  { %v494_v58 = vpop.f32.mrb[4].mxu1 }
 0x7d5   :  { %v1101_v59 = vpop.f32.mrb[5].mxu1  ;;  %v498_v1 = vmul.f32 %v494_v58, %v421_v53  ;;  %v929_v53 = vsel %vm289_vm4, %v1525_v42, 0.0 }
 0x80a   :  { %v613_v60 = vpop.f32.mrb[6].mxu1 }
 0x80b   :  { %1176 = vrsqrt.f32 %v613_v60  ;;  %v1106_v61 = vpop.f32.mrb[7].mxu1 }
 0x815   :  { %v1177_v62 = vpop.eup %1176 }
 0x816   :  { %620 = vperm.xlu0 %1169, %v1177_v62  }
 0x81a   :  { %499 = vrot.lane.b32.xlu0 %v1507_v16, %s1380_s14 }
 0x81e   :  { %784 = vrot.lane.b32.xlu0 %v1507_v16, %s1382_s15 }
 0x895   :  { %v621_v63 = vpop.permute.xlu0 %620 }
 0x896   :  { %v623_v0 = vmul.f32 %v1509_v17, %v621_v63 }
 0x898   :  { %625 = vrot.lane.b32.xlu1 %v623_v0, %s1380_s14 }
 0x899   :  { %v500_v2 = vpop.permute.xlu0 %499 }
 0x89a   :  { %v502_v3 = vadd.f32 %v500_v2, %v498_v1 }
 0x89c   :  { %1116 = vmatprep.mubr.msk.f32.mxu1 %vm702_vm7, %v502_v3  ;;  %976 = vst.msk [vmem:[#allocation13] sm:$0xff] %vm702_vm7, %v502_v3 }
 0x89d   :  { %v785_v12 = vpop.permute.xlu0 %784 }
 0x90a   :  { %v626_v4 = vpop.permute.xlu1 %625 }
 0x90b   :  { %1108 = vmatpush3.msra.mxu0 %v626_v4 }
 0x90c   :  { %1110 = vmatmul.mubr.msk.f32.vlgmr.msra.gmra.mrb[2].mxu0 %vm289_vm4, %v528_v57 }
 0x9df   :  { %v694_v8 = vpop.f32.mrb[2].mxu0 }
 0x9e0   :  { %v698_v9 = vmul.f32 %v694_v8, %v621_v63  ;;  %v1111_v10 = vpop.f32.mrb[3].mxu0 }
 0x9e2   :  { %v699_v11 = vadd.f32 %v698_v9, %v500_v2 }
 0x9e4   :  { %1117 = vmatmul.mubr.msk.f32.vlgmr.msra.gmra.mrb[8].mxu1 %vm702_vm7, %v699_v11 }
 0xab7   :  { %v1118_v13 = vpop.f32.mrb[8].mxu1 }
 0xab8   :  { %v788_v14 = vadd.f32 %v1118_v13, %v785_v12  ;;  %v775_v15 = vpop.f32.mrb[9].mxu1 }
 0xab9   :  { %v1555_v17 = vadd.f32 %v785_v12, %v775_v15 }
 0xaba   :  { %v790_v18 = vmul.f32 %v788_v14, %v788_v14 }
 0xabb   :  { %v789_v19 = vmul.f32 %v1555_v17, %v1555_v17 }
 0xabc   :  { %v794_v20 = vsel %vm702_vm7, %v790_v18, 0.0 }
 0xabd   :  { %795 = vadd.xlane.f32.xlu1 %v794_v20  ;;  %v791_v16 = vsel %vm702_vm7, %v789_v19, 0.0 }
 0xabe   :  { %792 = vadd.xlane.f32.xlu0 %v791_v16 }
 0xb4a   :  { %v796_v21 = vpop.xlane.xlu1 %795 }
 0xb4b   :  { %v798_v22 = vadd.f32 1e-24, %v796_v21  ;;  %v793_v23 = vpop.xlane.xlu0 %792 }
 0xb4c   :  { %v797_v24 = vadd.f32 1e-24, %v793_v23 }
 0xb4d   :  { %1178 = vrsqrt.f32 %v798_v22 }
 0xb4e   :  { %1180 = vrsqrt.f32 %v797_v24 }
 0xb57   :  { %v1179_v25 = vpop.eup %1178 }
 0xb58   :  { %v1181_v26 = vpop.eup %1180  ;;  %v802_v27 = vmul.f32 %v1179_v25, %v788_v14 }
 0xb59   :  { %v801_v28 = vmul.f32 %v1181_v26, %v1555_v17 }
 0xb5b   :  { %1123 = vmatprep.mubr.msk.f32.mxu0 %vm702_vm7, %v801_v28  ;;  %v1138_v29 = vpack.c.bf16 %v802_v27, %v801_v28  ;;  %v890_v30 = vmul.f32 %v802_v27, %v801_v28 }
 0xb5d   :  { %1140 = vmatprep.subr.msk.bf16.mxu0 %vm1139_vm8, %v1138_v29  ;;  %v891_v39 = vsel %vm702_vm7, %v890_v30, 0.0 }
 0xb5e   :  { %1143 = vmatpush3.bf16.xpose.msk.msra.mxu0 %vm1139_vm8, %v1138_v29 }
 0xb65   :  { %1124 = vmatmul.mubr.msk.f32.vlgmr.msra.gmra.mrb[4].mxu0 %vm702_vm7, %v802_v27 }
 0xc38   :  { %v1125_v31 = vpop.f32.mrb[4].mxu0 }
 0xc39   :  { %v885_v32 = vmul.f32 2.0, %v1125_v31  ;;  %v875_v33 = vpop.f32.mrb[5].mxu0 }
 0xc3a   :  { %v884_v34 = vmul.f32 2.0, %v875_v33 }
 0xc3b   :  { %v888_v35 = vmul.f32 1.442695, %v885_v32 }
 0xc3c   :  { %v886_v36 = vmul.f32 1.442695, %v884_v34 }
 0xc3d   :  { %1182 = vpow2.f32 %v888_v35 }
 0xc3e   :  { %1184 = vpow2.f32 %v886_v36 }
 0xc47   :  { %v1183_v37 = vpop.eup %1182 }
 0xc48   :  { %v1185_v38 = vpop.eup %1184  ;;  %905 = vrot.lane.b32.xlu1 %v1183_v37, %s1383_s16  ;;  %v924_v41 = vsel %vm702_vm7, %v1183_v37, 0.0 }
 0xc49   :  { %903 = vrot.lane.b32.xlu0 %v1185_v38, %s1383_s16  ;;  %v921_v40 = vsel %vm702_vm7, %v1185_v38, 0.0 }
 0xc4d   :  { %898 = vrot.lane.b32.xlu0 %v1535_v51, %s1380_s14 }
 0xc6c   :  { %892 = vadd.xlane.f32.xlu0 %v891_v39  ;;  %922 = vadd.xlane.f32.xlu1 %v921_v40 }
 0xc70   :  { %925 = vadd.xlane.f32.xlu0 %v924_v41 }
 0xcba   :  { %v906_v43 = vpop.permute.xlu1 %905 }
 0xcbb   :  { %v904_v44 = vpop.permute.xlu0 %903  ;;  %v910_v45 = vadd.f32 %v1183_v37, %v906_v43 }
 0xcbc   :  { %v909_v46 = vadd.f32 %v1185_v38, %v904_v44 }
 0xcbe   :  { %v911_v51 = vmul.f32 %v909_v46, %v1525_v42 }
 0xcbf   :  { %v899_v47 = vpop.permute.xlu0 %898 }
 0xcc0   :  { %v912_v48 = vmul.f32 %v910_v45, %v899_v47  ;;  %v932_v49 = vsel %vm289_vm4, %v899_v47, 0.0  ;;  %v913_v52 = vsel %vm289_vm4, %v911_v51, 0.0 }
 0xcc1   :  { %933 = vadd.xlane.f32.xlu1 %v932_v49 }
 0xcc2   :  { %v916_v50 = vsel %vm289_vm4, %v912_v48, 0.0 }
 0xcc3   :  { %917 = vadd.xlane.f32.xlu0 %v916_v50 }
 0xcc7   :  { %914 = vadd.xlane.f32.xlu0 %v913_v52 }
 0xccb   :  { %930 = vadd.xlane.f32.xlu0 %v929_v53 }
 0xcf9   :  { %v893_v54 = vpop.xlane.xlu0 %892  ;;  %v923_v59 = vpop.xlane.xlu1 %922 }
 0xcfa   :  { %v894_v55 = vmul.f32 2.0, %v893_v54  ;;  %v1050_v60 = vadd.f32 -7.389056, %v923_v59 }
 0xcfc   :  { %v895_v57 = vmul.f32 1.442695, %v894_v55 }
 0xcfd   :  { %v926_v56 = vpop.xlane.xlu0 %925 }
 0xcfe   :  { %v1051_v58 = vadd.f32 -7.389056, %v926_v56  ;;  %1186 = vpow2.f32 %v895_v57 }
 0xd00   :  { %1188 = vrcp.f32 %v1051_v58 }
 0xd01   :  { %1190 = vrcp.f32 %v1050_v60 }
 0xd08   :  { %v1187_v63 = vpop.eup %1186 }
 0xd0a   :  { %v1189_v2 = vpop.eup %1188 }
 0xd0b   :  { %v1191_v6 = vpop.eup %1190 }
 0xd4e   :  { %v934_v61 = vpop.xlane.xlu1 %933 }
 0xd4f   :  { %v936_v62 = vmul.f32 2.0, %v934_v61 }
 0xd50   :  { %v918_v0 = vpop.xlane.xlu0 %917 }
 0xd51   :  { %v920_v1 = vadd.f32 %v1187_v63, %v918_v0  ;;  %v938_v3 = vadd.f32 1.0, %v936_v62 }
 0xd53   :  { %v942_v4 = vmul.f32 %v1189_v2, %v920_v1 }
 0xd54   :  { %v915_v42 = vpop.xlane.xlu0 %914 }
 0xd55   :  { %1192 = vlog2.f32 %v942_v4  ;;  %v919_v5 = vadd.f32 %v1187_v63, %v915_v42 }
 0xd56   :  { %1194 = vrcp.f32 %v938_v3 }
 0xd57   :  { %v940_v7 = vmul.f32 %v1191_v6, %v919_v5 }
 0xd58   :  { %v931_v8 = vpop.xlane.xlu0 %930 }
 0xd59   :  { %1196 = vlog2.f32 %v940_v7  ;;  %v935_v9 = vmul.f32 2.0, %v931_v8 }
 0xd5b   :  { %v937_v10 = vadd.f32 1.0, %v935_v9 }
 0xd5d   :  { %1198 = vrcp.f32 %v937_v10 }
 0xd5f   :  { %v1193_v11 = vpop.eup %1192 }
 0xd60   :  { %v946_v12 = vmul.f32 0.6931472, %v1193_v11  ;;  %v1195_v13 = vpop.eup %1194 }
 0xd62   :  { %v950_v14 = vmul.f32 %v1195_v13, %v946_v12 }
 0xd63   :  { %v1197_v15 = vpop.eup %1196 }
 0xd64   :  { %v964_v18 = vsel %vm951_vm9, %v950_v14, 0.0  ;;  %v944_v19 = vmul.f32 0.6931472, %v1197_v15 }
 0xd65   :  { %965 = vadd.xlane.f32.xlu1 %v964_v18 }
 0xd67   :  { %v1199_v20 = vpop.eup %1198 }
 0xd68   :  { %v948_v16 = vmul.f32 %v1199_v20, %v944_v19 }
 0xd6a   :  { %v952_v21 = vsel %vm951_vm9, %v948_v16, 0.0 }
 0xd6b   :  { %953 = vadd.xlane.f32.xlu0 %v952_v21 }
 0xd81   :  { %978 = vrot.lane.b32.xlu0 %v1555_v17, %s1384_s17 }
 0xd82   :  { %1311 = shalt.err (!%p1308_p13)
}
 0xd83   :  { %s1312_s21 = scalar_lea.hbm %s1621_s6, 128 }
 0xd84   :  { %p1313_p0 = scmp.ne.s32.totalorder %s1621_s6, %s1312_s21  ;;  %p1316_p1 = scmp.lt.u32.totalorder %s1312_s21, %s1621_s6 }
 0xd86   :  { %p1318_p2 = pnand %p1316_p1, %p1313_p0 }
 0xd88   :  { %1321 = shalt.err (!%p1318_p2)
}
 0xd89   :  { %996 = dma.vmem_to_hbm [thread:$0]  %s994_s18, 128, %s1621_s6, [#allocation4]  }
 0xd8a   :  { %s1386_s28 = smov [#allocation14]  }
 0xd8b   :  { %s1003_s30 = sshll.u32 %s1386_s28, 4  ;;  %s1004_s30 = int_to_ptr.vmem [resolvable:$true] %s1003_s30 }
 0xd8c   :  { %s1322_s9 = scalar_lea.vmem %s1004_s30, 128  ;;  %p1327_p4 = scmp.lt.s32.totalorder %s1004_s30, %s1004_s30 }
 0xd8d   :  { %p1323_p3 = scmp.ne.s32.totalorder %s1004_s30, %s1322_s9  ;;  %p1328_p5 = scmp.lt.s32.totalorder %s1322_s9, %s1322_s9 }
 0xd8f   :  { %p1329_p6 = por %p1328_p5, %p1327_p4 }
 0xd91   :  { %p1330_p7 = pnand %p1329_p6, %p1323_p3 }
 0xdf2   :  { %v966_v17 = vpop.xlane.xlu1 %965 }
 0xdf3   :  { %v967_v22 = vrot.slane %v966_v17, 4 }
 0xdf5   :  { %v968_v23 = vadd.f32 %v967_v22, %v966_v17 }
 0xdf7   :  { %v969_v24 = vrot.slane %v968_v23, 2 }
 0xdf8   :  { %v954_v25 = vpop.xlane.xlu0 %953 }
 0xdf9   :  { %v955_v26 = vrot.slane %v954_v25, 4  ;;  %v970_v28 = vadd.f32 %v969_v24, %v968_v23 }
 0xdfb   :  { %v956_v27 = vadd.f32 %v955_v26, %v954_v25 }
 0xdfc   :  { %v979_v29 = vpop.permute.xlu0 %978 }
 0xdfd   :  { %v957_v30 = vrot.slane %v956_v27, 2  ;;  %981 = vst.msk [vmem:[#allocation14] sm:$0xff] %vm124_vm1, %v979_v29 }
 0xdfe   :  { %1333 = shalt.err (!%p1330_p7)
}
 0xdff   :  { %s1334_s3 = scalar_lea.hbm %s1622_s7, 128 }
 0xe00   :  { %p1335_p8 = scmp.ne.s32.totalorder %s1622_s7, %s1334_s3  ;;  %p1338_p9 = scmp.lt.u32.totalorder %s1334_s3, %s1622_s7 }
 0xe02   :  { %p1340_p10 = pnand %p1338_p9, %p1335_p8 }
 0xe04   :  { %1343 = shalt.err (!%p1340_p10)
}
 0xe05   :  { %1006 = dma.vmem_to_hbm [thread:$0]  %s1004_s30, 128, %s1622_s7, [#allocation15]   ;;  %v958_v31 = vadd.f32 %v957_v30, %v956_v27  ;;  %v971_v32 = vrot.slane %v970_v28, 1 }
 0xe06   :  { %s1344_s7 = scalar_lea.hbm %s1623_s8, 16 }
 0xe07   :  { %v959_v33 = vrot.slane %v958_v31, 1  ;;  %v972_v35 = vadd.f32 %v971_v32, %v970_v28  ;;  %p1345_p11 = scmp.ne.s32.totalorder %s1623_s8, %s1344_s7  ;;  %p1348_p12 = scmp.lt.u32.totalorder %s1344_s7, %s1623_s8 }
 0xe09   :  { %v960_v34 = vadd.f32 %v959_v33, %v958_v31  ;;  %p1350_p13 = pnand %p1348_p12, %p1345_p11 }
 0xe0b   :  { %1144 = vpush %v960_v34 }
 0xe0c   :  { %1146 = vpush %v972_v35 }
 0xe3c   :  { %s1145_s13 = spop %1144 }
 0xe3d   :  { %s962_s14 = ssub.f32 0.0, %s1145_s13  ;;  %s1147_s15 = spop %1146 }
 0xe3e   :  { %s974_s16 = ssub.f32 0.0, %s1147_s15 }
 0xe3f   :  { %s963_s17 = smul.f32 0.125, %s962_s14 }
 0xe40   :  { %s975_s0 = smul.f32 0.125, %s974_s16 }
 0xe41   :  { %s982_s18 = smul.f32 0.5, %s963_s17 }
 0xe42   :  { %s983_s1 = smul.f32 0.5, %s975_s0 }
 0xe44   :  { %s984_s19 = sadd.f32 %s983_s1, %s982_s18 }
 0xe46   :  { %986 = sst [smem:[#allocation16]] %s984_s19 }
 0xe47   :  { %1353 = shalt.err (!%p1350_p13)
}
 0xe48   :  { %s1387_s2 = smov [#allocation16]  }
 0xe49   :  { %1014 = dma.smem_to_hbm %s1387_s2, 16, %s1623_s8, [#allocation5]  }
 0xe4a   :  { %1362 = dma.done.wait [#allocation4], 128  }
 0xe4b   :  { %1363 = vsyncadd [#allocation4], 4294967168 }
 0xe4c   :  { %1364 = dma.done.wait [#allocation15], 128  }
 0xe4d   :  { %1365 = vsyncadd [#allocation15], 4294967168 }
 0xe4e   :  { %1366 = dma.done.wait [#allocation5], 16  }
 0xe4f   :  { %1367 = vsyncadd [#allocation5], 4294967280 }
 0xe50   :  { %1024 = sfence }
 0xe51   :  { %1025 = vsyncpa [#allocation3], 1 }
 0xe52   :  { %1026 = vsyncpa [#allocation9], 1 }
 0xe53   :  { %1027 = vsyncpa [#allocation12], 1 }
 0xe54   :  { %1028 = vsyncpa [#allocation4], 1 }
 0xe55   :  { %1029 = vsyncpa [#allocation15], 1 }
 0xe56   :  { %1030 = vsyncpa [#allocation5], 1 }
 0xe57   :  { %1031 = vsyncpa [#allocation6], 1 }

</bundles_post_ra>
